<compile_context>
chip_gen: v7x
topology: tpu7x:2x2x1
jax: 0.10.0
libtpu: 0.0.40
codegen_flags: <defaults>
</compile_context>

<pallas_src>
import jax
import jax.numpy as jnp
from jax.experimental import pallas as pl
from jax.experimental.pallas import tpu as pltpu

K = 3            # conv kernel size
C_IN = 13        # mfcc channels
C_MID = 32
C_OUT = 64
N_CLASSES = 3


def audio_classifier_kernel(x_ref, w1_ref, b1_ref, w2_ref, b2_ref,
                            wfc_ref, bfc_ref, out_ref):
    # x_ref block: (BLK_B * T, C_IN) -- BLK_B whole clips, batch folded into
    # the sublane/M dimension.  out_ref block: (BLK_B, N_CLASSES).
    n_rows = x_ref.shape[0]
    blk_b = out_ref.shape[0]
    seq_t = n_rows // blk_b                      # per-clip length T

    x = x_ref[...].astype(jnp.float32)           # (n_rows, C_IN)

    # Conv1d(13 -> 32, k=3): sum of K sublane-shifted MXU matmuls over the
    # batch-folded sequence (rows that straddle clip boundaries are garbage
    # and get masked out in the pooling step below).
    n1 = n_rows - (K - 1)
    acc1 = jnp.dot(x[0:n1, :], w1_ref[0], preferred_element_type=jnp.float32)
    for k in range(1, K):
        acc1 = acc1 + jnp.dot(x[k:k + n1, :], w1_ref[k],
                              preferred_element_type=jnp.float32)
    h1 = jnp.maximum(acc1 + b1_ref[...], 0.0)    # (n1, C_MID)

    # Conv1d(32 -> 64, k=3)
    n2 = n1 - (K - 1)
    acc2 = jnp.dot(h1[0:n2, :], w2_ref[0], preferred_element_type=jnp.float32)
    for k in range(1, K):
        acc2 = acc2 + jnp.dot(h1[k:k + n2, :], w2_ref[k],
                              preferred_element_type=jnp.float32)
    h2 = jnp.maximum(acc2 + b2_ref[...], 0.0)    # (n2, C_OUT)

    # AdaptiveAvgPool1d(1): per-clip masked mean expressed as one MXU matmul.
    # Conv2 output row r corresponds to global start position r; it belongs
    # to clip b = r // T and is valid iff it does not cross a clip boundary,
    # i.e. r in [b*T, b*T + L2) with L2 = T - 2*(K-1).
    L2 = seq_t - 2 * (K - 1)
    r_idx = jax.lax.broadcasted_iota(jnp.int32, (blk_b, n2), 1)
    b_idx = jax.lax.broadcasted_iota(jnp.int32, (blk_b, n2), 0)
    start = b_idx * seq_t
    valid = jnp.logical_and(r_idx >= start, r_idx < start + L2)
    pool_mat = jnp.where(valid, 1.0 / L2, 0.0)   # (blk_b, n2)
    pooled = jnp.dot(pool_mat, h2, preferred_element_type=jnp.float32)  # (blk_b, C_OUT)

    # Linear(64 -> 3), batched lane-wise writeback of the whole block.
    out = jnp.dot(pooled, wfc_ref[...],
                  preferred_element_type=jnp.float32) + bfc_ref[...]
    out_ref[...] = out.astype(out_ref.dtype)


def audio_classifier_forward(x_nct, params, *, max_blk_b=64):
    """x_nct: (B, 13, T) float32, matching the PyTorch NCW convention."""
    w1, b1, w2, b2, wfc, bfc = params
    B, C, T = x_nct.shape
    assert C == C_IN and T >= 2 * (K - 1) + 1

    # Many clips per grid step; pad the batch so every block is full.
    blk_b = min(B, max_blk_b)                    # blk_b=64 keeps blocks 8-aligned
    b_pad = -(-B // blk_b) * blk_b
    x = jnp.transpose(x_nct, (0, 2, 1))          # (B, T, C_IN)
    if b_pad != B:
        x = jnp.concatenate(
            [x, jnp.zeros((b_pad - B, T, C_IN), x.dtype)], axis=0)
    x2d = x.reshape(b_pad * T, C_IN)             # batch folded into MXU M dim

    grid = (b_pad // blk_b,)
    out = pl.pallas_call(
        audio_classifier_kernel,
        out_shape=jax.ShapeDtypeStruct((b_pad, N_CLASSES), jnp.float32),
        grid=grid,
        in_specs=[
            pl.BlockSpec((blk_b * T, C_IN), lambda i: (i, 0)),
            pl.BlockSpec((K, C_IN, C_MID), lambda i: (0, 0, 0)),
            pl.BlockSpec((1, C_MID), lambda i: (0, 0)),
            pl.BlockSpec((K, C_MID, C_OUT), lambda i: (0, 0, 0)),
            pl.BlockSpec((1, C_OUT), lambda i: (0, 0)),
            pl.BlockSpec((C_OUT, N_CLASSES), lambda i: (0, 0)),
            pl.BlockSpec((1, N_CLASSES), lambda i: (0, 0)),
        ],
        out_specs=pl.BlockSpec((blk_b, N_CLASSES), lambda i: (i, 0)),
        compiler_params=pltpu.CompilerParams(
            dimension_semantics=("parallel",)),   # v7x: shard batch across 2 TCs
    )(x2d, w1, b1, w2, b2, wfc, bfc)
    return out[:B]                                # (B, 3)


def init_params(key):
    """Deterministic synthetic init (PyTorch-style uniform(-1/sqrt(fan_in)))."""
    ks = jax.random.split(key, 6)

    def u(k, shape, fan_in):
        bound = 1.0 / jnp.sqrt(float(fan_in))
        return jax.random.uniform(k, shape, jnp.float32, -bound, bound)

    # Conv weights stored as (K, C_in, C_out) -- the kernel's matmul layout.
    w1 = u(ks[0], (K, C_IN, C_MID), C_IN * K)
    b1 = u(ks[1], (1, C_MID), C_IN * K)
    w2 = u(ks[2], (K, C_MID, C_OUT), C_MID * K)
    b2 = u(ks[3], (1, C_OUT), C_MID * K)
    wfc = u(ks[4], (C_OUT, N_CLASSES), C_OUT)
    bfc = u(ks[5], (1, N_CLASSES), C_OUT)
    return (w1, b1, w2, b2, wfc, bfc)


def reference_forward(x_nct, params):
    """Plain-JAX reference with identical semantics (for correctness check)."""
    w1, b1, w2, b2, wfc, bfc = params
    x = jnp.transpose(x_nct, (0, 2, 1))          # (B, T, C_IN)
    B, T, _ = x.shape
    L1 = T - (K - 1)
    acc1 = jnp.zeros((B, L1, C_MID), jnp.float32) + b1[None]
    for k in range(K):
        acc1 = acc1 + jnp.einsum('btc,cd->btd', x[:, k:k + L1, :], w1[k])
    h1 = jnp.maximum(acc1, 0.0)
    L2 = L1 - (K - 1)
    acc2 = jnp.zeros((B, L2, C_OUT), jnp.float32) + b2[None]
    for k in range(K):
        acc2 = acc2 + jnp.einsum('btc,cd->btd', h1[:, k:k + L2, :], w2[k])
    h2 = jnp.maximum(acc2, 0.0)
    pooled = jnp.mean(h2, axis=1)                # (B, C_OUT)
    return pooled @ wfc + bfc


if __name__ == "__main__":
    key = jax.random.PRNGKey(0)
    k_x, k_p = jax.random.split(key)

    B, T = 2, 16                                           # small MFCC clip
    x = jax.random.normal(k_x, (B, C_IN, T), jnp.float32)  # NCW like PyTorch
    params = init_params(k_p)

    out = audio_classifier_forward(x, params)
    out = jax.block_until_ready(out)

    ref = reference_forward(x, params)
    assert out.shape == (B, N_CLASSES)
    assert jnp.allclose(out, ref, atol=1e-4, rtol=1e-4), (out, ref)

    print("KERNEL_OK")
</pallas_src>

<mosaic_0001>
module attributes {stable_mosaic.version = 11 : i64} {
  func.func @audio_classifier_kernel(%arg0: i32, %arg1: memref<32x13xf32, #tpu.memory_space<vmem>>, %arg2: memref<3x13x32xf32, #tpu.memory_space<vmem>>, %arg3: memref<1x32xf32, #tpu.memory_space<vmem>>, %arg4: memref<3x32x64xf32, #tpu.memory_space<vmem>>, %arg5: memref<1x64xf32, #tpu.memory_space<vmem>>, %arg6: memref<64x3xf32, #tpu.memory_space<vmem>>, %arg7: memref<1x3xf32, #tpu.memory_space<vmem>>, %arg8: memref<2x3xf32, #tpu.memory_space<vmem>>) attributes {dimension_semantics = [#tpu.dimension_semantics<parallel>], iteration_bounds = array<i64: 1>, scalar_prefetch = 0 : i64, scratch_operands = 0 : i64, tpu.core_type = #tpu.core_type<tc>, window_params = [{transform_indices = @transform_0, window_bounds = array<i64: 32, 13>}, {pipeline_mode = #tpu.pipeline_mode<synchronous>, transform_indices = @transform_1, window_bounds = array<i64: 3, 13, 32>}, {pipeline_mode = #tpu.pipeline_mode<synchronous>, transform_indices = @transform_2, window_bounds = array<i64: 1, 32>}, {pipeline_mode = #tpu.pipeline_mode<synchronous>, transform_indices = @transform_3, window_bounds = array<i64: 3, 32, 64>}, {pipeline_mode = #tpu.pipeline_mode<synchronous>, transform_indices = @transform_4, window_bounds = array<i64: 1, 64>}, {pipeline_mode = #tpu.pipeline_mode<synchronous>, transform_indices = @transform_5, window_bounds = array<i64: 64, 3>}, {pipeline_mode = #tpu.pipeline_mode<synchronous>, transform_indices = @transform_6, window_bounds = array<i64: 1, 3>}, {transform_indices = @transform_7, window_bounds = array<i64: 2, 3>}]} {
    %c0 = arith.constant 0 : index
    %c0_0 = arith.constant 0 : index
    %0 = vector.load %arg1[%c0, %c0_0] : memref<32x13xf32, #tpu.memory_space<vmem>>, vector<32x13xf32>
    %1 = vector.extract_strided_slice %0 {offsets = [0, 0], sizes = [30, 13], strides = [1, 1]} : vector<32x13xf32> to vector<30x13xf32>
    %c0_1 = arith.constant 0 : index
    %c0_2 = arith.constant 0 : index
    %c0_3 = arith.constant 0 : index
    %2 = vector.load %arg2[%c0_1, %c0_2, %c0_3] : memref<3x13x32xf32, #tpu.memory_space<vmem>>, vector<1x13x32xf32>
    %3 = vector.shape_cast %2 : vector<1x13x32xf32> to vector<13x32xf32>
    %cst = arith.constant dense<0.000000e+00> : vector<30x32xf32>
    %4 = tpu.matmul %1, %3, %cst {dimension_numbers = #tpu.dot_dimension_numbers<[1], [0], [0], [1], [0, 0, 1, 1], [], []>} : vector<30x13xf32>, vector<13x32xf32>, vector<30x32xf32> -> vector<30x32xf32>
    %5 = vector.extract_strided_slice %0 {offsets = [1, 0], sizes = [30, 13], strides = [1, 1]} : vector<32x13xf32> to vector<30x13xf32>
    %c1 = arith.constant 1 : index
    %c0_4 = arith.constant 0 : index
    %c0_5 = arith.constant 0 : index
    %6 = vector.load %arg2[%c1, %c0_4, %c0_5] : memref<3x13x32xf32, #tpu.memory_space<vmem>>, vector<1x13x32xf32>
    %7 = vector.shape_cast %6 : vector<1x13x32xf32> to vector<13x32xf32>
    %cst_6 = arith.constant dense<0.000000e+00> : vector<30x32xf32>
    %8 = tpu.matmul %5, %7, %cst_6 {dimension_numbers = #tpu.dot_dimension_numbers<[1], [0], [0], [1], [0, 0, 1, 1], [], []>} : vector<30x13xf32>, vector<13x32xf32>, vector<30x32xf32> -> vector<30x32xf32>
    %9 = arith.addf %4, %8 : vector<30x32xf32>
    %10 = vector.extract_strided_slice %0 {offsets = [2, 0], sizes = [30, 13], strides = [1, 1]} : vector<32x13xf32> to vector<30x13xf32>
    %c2 = arith.constant 2 : index
    %c0_7 = arith.constant 0 : index
    %c0_8 = arith.constant 0 : index
    %11 = vector.load %arg2[%c2, %c0_7, %c0_8] : memref<3x13x32xf32, #tpu.memory_space<vmem>>, vector<1x13x32xf32>
    %12 = vector.shape_cast %11 : vector<1x13x32xf32> to vector<13x32xf32>
    %cst_9 = arith.constant dense<0.000000e+00> : vector<30x32xf32>
    %13 = tpu.matmul %10, %12, %cst_9 {dimension_numbers = #tpu.dot_dimension_numbers<[1], [0], [0], [1], [0, 0, 1, 1], [], []>} : vector<30x13xf32>, vector<13x32xf32>, vector<30x32xf32> -> vector<30x32xf32>
    %14 = arith.addf %9, %13 : vector<30x32xf32>
    %c0_10 = arith.constant 0 : index
    %c0_11 = arith.constant 0 : index
    %15 = vector.load %arg3[%c0_10, %c0_11] : memref<1x32xf32, #tpu.memory_space<vmem>>, vector<1x32xf32>
    %16 = vector.broadcast %15 : vector<1x32xf32> to vector<30x32xf32>
    %17 = arith.addf %14, %16 : vector<30x32xf32>
    %cst_12 = arith.constant 0.000000e+00 : f32
    %18 = vector.broadcast %cst_12 : f32 to vector<30x32xf32>
    %19 = arith.maximumf %17, %18 : vector<30x32xf32>
    %20 = vector.extract_strided_slice %19 {offsets = [0, 0], sizes = [28, 32], strides = [1, 1]} : vector<30x32xf32> to vector<28x32xf32>
    %c0_13 = arith.constant 0 : index
    %c0_14 = arith.constant 0 : index
    %c0_15 = arith.constant 0 : index
    %21 = vector.load %arg4[%c0_13, %c0_14, %c0_15] : memref<3x32x64xf32, #tpu.memory_space<vmem>>, vector<1x32x64xf32>
    %22 = vector.shape_cast %21 : vector<1x32x64xf32> to vector<32x64xf32>
    %cst_16 = arith.constant dense<0.000000e+00> : vector<28x64xf32>
    %23 = tpu.matmul %20, %22, %cst_16 {dimension_numbers = #tpu.dot_dimension_numbers<[1], [0], [0], [1], [0, 0, 1, 1], [], []>} : vector<28x32xf32>, vector<32x64xf32>, vector<28x64xf32> -> vector<28x64xf32>
    %24 = vector.extract_strided_slice %19 {offsets = [1, 0], sizes = [28, 32], strides = [1, 1]} : vector<30x32xf32> to vector<28x32xf32>
    %c1_17 = arith.constant 1 : index
    %c0_18 = arith.constant 0 : index
    %c0_19 = arith.constant 0 : index
    %25 = vector.load %arg4[%c1_17, %c0_18, %c0_19] : memref<3x32x64xf32, #tpu.memory_space<vmem>>, vector<1x32x64xf32>
    %26 = vector.shape_cast %25 : vector<1x32x64xf32> to vector<32x64xf32>
    %cst_20 = arith.constant dense<0.000000e+00> : vector<28x64xf32>
    %27 = tpu.matmul %24, %26, %cst_20 {dimension_numbers = #tpu.dot_dimension_numbers<[1], [0], [0], [1], [0, 0, 1, 1], [], []>} : vector<28x32xf32>, vector<32x64xf32>, vector<28x64xf32> -> vector<28x64xf32>
    %28 = arith.addf %23, %27 : vector<28x64xf32>
    %29 = vector.extract_strided_slice %19 {offsets = [2, 0], sizes = [28, 32], strides = [1, 1]} : vector<30x32xf32> to vector<28x32xf32>
    %c2_21 = arith.constant 2 : index
    %c0_22 = arith.constant 0 : index
    %c0_23 = arith.constant 0 : index
    %30 = vector.load %arg4[%c2_21, %c0_22, %c0_23] : memref<3x32x64xf32, #tpu.memory_space<vmem>>, vector<1x32x64xf32>
    %31 = vector.shape_cast %30 : vector<1x32x64xf32> to vector<32x64xf32>
    %cst_24 = arith.constant dense<0.000000e+00> : vector<28x64xf32>
    %32 = tpu.matmul %29, %31, %cst_24 {dimension_numbers = #tpu.dot_dimension_numbers<[1], [0], [0], [1], [0, 0, 1, 1], [], []>} : vector<28x32xf32>, vector<32x64xf32>, vector<28x64xf32> -> vector<28x64xf32>
    %33 = arith.addf %28, %32 : vector<28x64xf32>
    %c0_25 = arith.constant 0 : index
    %c0_26 = arith.constant 0 : index
    %34 = vector.load %arg5[%c0_25, %c0_26] : memref<1x64xf32, #tpu.memory_space<vmem>>, vector<1x64xf32>
    %35 = vector.broadcast %34 : vector<1x64xf32> to vector<28x64xf32>
    %36 = arith.addf %33, %35 : vector<28x64xf32>
    %cst_27 = arith.constant 0.000000e+00 : f32
    %37 = vector.broadcast %cst_27 : f32 to vector<28x64xf32>
    %38 = arith.maximumf %36, %37 : vector<28x64xf32>
    %39 = tpu.iota {dimensions = array<i32: 1>} : vector<2x28xi32>
    %40 = tpu.iota {dimensions = array<i32: 0>} : vector<2x28xi32>
    %c16_i32 = arith.constant 16 : i32
    %41 = vector.broadcast %c16_i32 : i32 to vector<2x28xi32>
    %42 = arith.muli %40, %41 : vector<2x28xi32>
    %43 = arith.cmpi sge, %39, %42 : vector<2x28xi32>
    %c12_i32 = arith.constant 12 : i32
    %44 = vector.broadcast %c12_i32 : i32 to vector<2x28xi32>
    %45 = arith.addi %42, %44 : vector<2x28xi32>
    %46 = arith.cmpi slt, %39, %45 : vector<2x28xi32>
    %47 = arith.andi %43, %46 : vector<2x28xi1>
    %cst_28 = arith.constant 0.0833333358 : f32
    %cst_29 = arith.constant 0.000000e+00 : f32
    %48 = vector.broadcast %cst_28 : f32 to vector<2x28xf32>
    %49 = vector.broadcast %cst_29 : f32 to vector<2x28xf32>
    %50 = arith.select %47, %48, %49 : vector<2x28xi1>, vector<2x28xf32>
    %cst_30 = arith.constant dense<0.000000e+00> : vector<2x64xf32>
    %51 = tpu.matmul %50, %38, %cst_30 {dimension_numbers = #tpu.dot_dimension_numbers<[1], [0], [0], [1], [0, 0, 1, 1], [], []>} : vector<2x28xf32>, vector<28x64xf32>, vector<2x64xf32> -> vector<2x64xf32>
    %c0_31 = arith.constant 0 : index
    %c0_32 = arith.constant 0 : index
    %52 = vector.load %arg6[%c0_31, %c0_32] : memref<64x3xf32, #tpu.memory_space<vmem>>, vector<64x3xf32>
    %cst_33 = arith.constant dense<0.000000e+00> : vector<2x3xf32>
    %53 = tpu.matmul %51, %52, %cst_33 {dimension_numbers = #tpu.dot_dimension_numbers<[1], [0], [0], [1], [0, 0, 1, 1], [], []>} : vector<2x64xf32>, vector<64x3xf32>, vector<2x3xf32> -> vector<2x3xf32>
    %c0_34 = arith.constant 0 : index
    %c0_35 = arith.constant 0 : index
    %54 = vector.load %arg7[%c0_34, %c0_35] : memref<1x3xf32, #tpu.memory_space<vmem>>, vector<1x3xf32>
    %55 = vector.broadcast %54 : vector<1x3xf32> to vector<2x3xf32>
    %56 = arith.addf %53, %55 : vector<2x3xf32>
    %c0_36 = arith.constant 0 : index
    %c0_37 = arith.constant 0 : index
    %57 = vector.load %arg8[%c0_36, %c0_37] : memref<2x3xf32, #tpu.memory_space<vmem>>, vector<2x3xf32>
    tpu.vector_store %arg8[%c0_36, %c0_37], %56 {strides = array<i32>} : memref<2x3xf32, #tpu.memory_space<vmem>>, vector<2x3xf32>,
    return
  }
  func.func @transform_0(%arg0: i32) -> (i32, i32) {
    %c0_i32 = arith.constant 0 : i32
    %c0_i32_0 = arith.constant 0 : i32
    return %arg0, %c0_i32 : i32, i32
  }
  func.func @transform_1(%arg0: i32) -> (i32, i32, i32) {
    %c0_i32 = arith.constant 0 : i32
    %c0_i32_0 = arith.constant 0 : i32
    %c0_i32_1 = arith.constant 0 : i32
    %c0_i32_2 = arith.constant 0 : i32
    return %c0_i32, %c0_i32_0, %c0_i32_1 : i32, i32, i32
  }
  func.func @transform_2(%arg0: i32) -> (i32, i32) {
    %c0_i32 = arith.constant 0 : i32
    %c0_i32_0 = arith.constant 0 : i32
    %c0_i32_1 = arith.constant 0 : i32
    return %c0_i32, %c0_i32_0 : i32, i32
  }
  func.func @transform_3(%arg0: i32) -> (i32, i32, i32) {
    %c0_i32 = arith.constant 0 : i32
    %c0_i32_0 = arith.constant 0 : i32
    %c0_i32_1 = arith.constant 0 : i32
    %c0_i32_2 = arith.constant 0 : i32
    return %c0_i32, %c0_i32_0, %c0_i32_1 : i32, i32, i32
  }
  func.func @transform_4(%arg0: i32) -> (i32, i32) {
    %c0_i32 = arith.constant 0 : i32
    %c0_i32_0 = arith.constant 0 : i32
    %c0_i32_1 = arith.constant 0 : i32
    return %c0_i32, %c0_i32_0 : i32, i32
  }
  func.func @transform_5(%arg0: i32) -> (i32, i32) {
    %c0_i32 = arith.constant 0 : i32
    %c0_i32_0 = arith.constant 0 : i32
    %c0_i32_1 = arith.constant 0 : i32
    return %c0_i32, %c0_i32_0 : i32, i32
  }
  func.func @transform_6(%arg0: i32) -> (i32, i32) {
    %c0_i32 = arith.constant 0 : i32
    %c0_i32_0 = arith.constant 0 : i32
    %c0_i32_1 = arith.constant 0 : i32
    return %c0_i32, %c0_i32_0 : i32, i32
  }
  func.func @transform_7(%arg0: i32) -> (i32, i32) {
    %c0_i32 = arith.constant 0 : i32
    %c0_i32_0 = arith.constant 0 : i32
    return %arg0, %c0_i32 : i32, i32
  }
}

</mosaic_0001>

<bundles_post_ra>
// kernel: tpu_custom_call.1
= control target key start
LH: loop header
LB: loop body
LE: loop exit
PB: predicated region body
PF: predicated region fallthrough
CT: control target
= control target key end

     0   :  { %12 = vsyncpa [#allocation3], 0  ;;  %s1446_s0 = inlined_call_operand.vmem [shape: f32[32,13], index: 0, kind: input, shape index: {}]   ;;  %s1447_s1 = inlined_call_operand.hbm [shape: f32[3,13,32], index: 1, kind: input, shape index: {}]   ;;  %s1448_s2 = inlined_call_operand.vmem [shape: f32[1,32], index: 2, kind: input, shape index: {}]   ;;  %s1449_s3 = inlined_call_operand.vmem [shape: f32[3,32,64], index: 3, kind: input, shape index: {}]   ;;  %s1450_s4 = inlined_call_operand.vmem [shape: f32[1,64], index: 4, kind: input, shape index: {}]   ;;  %s1451_s5 = inlined_call_operand.vmem [shape: f32[64,3], index: 5, kind: input, shape index: {}]   ;;  %s1452_s6 = inlined_call_operand.vmem [shape: f32[1,3], index: 6, kind: input, shape index: {}]   ;;  %s1453_s7 = inlined_call_operand.hbm [shape: f32[2,3], index: 7, kind: output, shape index: {}]  }
   0x1   :  { %13 = vsyncpa [#allocation4], 0  ;;  %s1239_s24 = smov [#allocation2]   ;;  %s1191_s28 = scalar_lea.hbm %s1447_s1, 768 }
   0x2   :  { %s21_s25 = sshll.u32 %s1239_s24, 4  ;;  %p1192_p0 = scmp.ne.s32.totalorder %s1447_s1, %s1191_s28  ;;  %s22_s25 = int_to_ptr.vmem [resolvable:$true] %s21_s25 }
   0x3   :  { %p1195_p1 = scmp.lt.u32.totalorder %s1191_s28, %s1447_s1 }
   0x5   :  { %p1197_p2 = pnand %p1195_p1, %p1192_p0 }
   0x7   :  { %1200 = shalt.err (!%p1197_p2)
}
   0x8   :  { %s1201_s10 = scalar_lea.vmem %s22_s25, 768  ;;  %p1206_p4 = scmp.lt.s32.totalorder %s22_s25, %s22_s25 }
   0x9   :  { %p1202_p3 = scmp.ne.s32.totalorder %s22_s25, %s1201_s10  ;;  %p1207_p5 = scmp.lt.s32.totalorder %s1201_s10, %s1201_s10 }
   0xb   :  { %p1208_p6 = por %p1207_p5, %p1206_p4 }
   0xd   :  { %p1209_p7 = pnand %p1208_p6, %p1202_p3 }
   0xf   :  { %1212 = shalt.err (!%p1209_p7)
}
  0x10   :  { %s1240_s11 = smov 128   ;;  %s1241_s12 = smov 8  }
  0x11   :  { %27 = dma.hbm_to_vmem [thread:$0]  %s1447_s1, 768, %s22_s25, [#allocation3], %s1240_s11, %s1240_s11, %s1241_s12  }
  0x12   :  { %1235 = dma.done.wait [#allocation3], 768  }
  0x13   :  { %1236 = vsyncadd [#allocation3], 4294966528  ;;  %vm71_vm0 = vcmask 1044480   ;;  %vm1242_vm1 = vmmov 1   ;;  %v48_v1 = vld [vmem:[#allocation2 + $0x10] sm:$0xff]  ;;  %v41_v3 = vld [vmem:[%s1446_s0] sm:$0xff] }
  0x14   :  { %vm1300_vm2 = vmpackc.low %vm71_vm0, %vm1242_vm1  ;;  %v49_v2 = vld [vmem:[#allocation2 + $0x18] sm:$0x1f]  ;;  %v42_v5 = vld [vmem:[%s1446_s0 + $0x8] sm:$0xff]  ;;  %vm54_vm3 = vcmask 1046528   ;;  %v55_v6 = vrot.slane %v41_v3, 1  ;;  %vm62_vm4 = vcmask 105472  }
  0x15   :  { %v1106_v4 = vpack.c.bf16 %v49_v2, %v48_v1  ;;  %v43_v7 = vld [vmem:[%s1446_s0 + $0x10] sm:$0xff]  ;;  %v45_v8 = vld [vmem:[#allocation2] sm:$0xff]  ;;  %v56_v9 = vrot.slane %v42_v5, 1  ;;  %v46_v11 = vld [vmem:[#allocation2 + $0x8] sm:$0x1f]  ;;  %v260_v24 = vrot.slane %v41_v3, 2 }
  0x16   :  { %v58_v10 = vrot.slane %v43_v7, 1  ;;  %v44_v12 = vld [vmem:[%s1446_s0 + $0x18] sm:$0xff]  ;;  %v1112_v13 = vpack.c.bf16 %v46_v11, %v45_v8  ;;  %v257_v15 = vld [vmem:[#allocation2 + $0x20] sm:$0xff]  ;;  %v258_v16 = vld [vmem:[#allocation2 + $0x28] sm:$0x1f]  ;;  %v261_v25 = vrot.slane %v42_v5, 2 }
  0x17   :  { %1108 = vmatprep.subr.msk.bf16.mxu0 %vm1300_vm2, %v1106_v4  ;;  %v60_v14 = vrot.slane %v44_v12, 1  ;;  %v57_v17 = vsel %vm54_vm3, %v55_v6, %v56_v9  ;;  %v382_v19 = vld [vmem:[%s1449_s3] sm:$0xff]  ;;  %v383_v20 = vld [vmem:[%s1449_s3 + $0x8] sm:$0xff]  ;;  %v1118_v22 = vpack.c.bf16 %v258_v16, %v257_v15  ;;  %vm259_vm5 = vcmask 1045504   ;;  %v384_v31 = vld [vmem:[%s1449_s3 + $0x10] sm:$0xff]  ;;  %s1246_s15 = smov [#allocation5]  }
  0x18   :  { %1111 = vmatpush3.bf16.msk.msra.mxu0 %vm1300_vm2, %v1106_v4  ;;  %v59_v18 = vsel %vm54_vm3, %v56_v9, %v58_v10  ;;  %1008 = vmatprep.mubr.msk.f32.mxu0 %vm62_vm4, %v57_v17  ;;  %v1132_v23 = vpack.c.bf16 %v383_v20, %v382_v19  ;;  %v263_v26 = vrot.slane %v43_v7, 2  ;;  %v262_v27 = vsel %vm259_vm5, %v260_v24, %v261_v25  ;;  %v385_v32 = vld [vmem:[%s1449_s3 + $0x18] sm:$0xff]  ;;  %v923_v34 = vld [vmem:[%s1449_s3 + $0x20] sm:$0xff]  ;;  %v924_v35 = vld [vmem:[%s1449_s3 + $0x28] sm:$0xff]  ;;  %s898_s16 = sshll.u32 %s1246_s15, 4  ;;  %s899_s16 = int_to_ptr.vmem [resolvable:$true] %s898_s16 }
  0x19   :  { %1114 = vmatprep.subr.msk.bf16.mxu0 %vm1300_vm2, %v1112_v13  ;;  %v61_v21 = vsel %vm54_vm3, %v58_v10, %v60_v14  ;;  %v265_v28 = vrot.slane %v44_v12, 2  ;;  %v1136_v33 = vpack.c.bf16 %v385_v32, %v384_v31  ;;  %v1124_v36 = vpack.c.bf16 %v924_v35, %v923_v34  ;;  %v935_v37 = vld [vmem:[%s1449_s3 + $0x40] sm:$0xff]  ;;  %v936_v38 = vld [vmem:[%s1449_s3 + $0x48] sm:$0xff]  ;;  %v925_v40 = vld [vmem:[%s1449_s3 + $0x30] sm:$0xff]  ;;  %s1213_s17 = scalar_lea.vmem %s899_s16, 32  ;;  %p1218_p9 = scmp.lt.s32.totalorder %s899_s16, %s899_s16 }
  0x1a   :  { %1133 = vmatprep.subr.bf16.mxu1 %v1132_v23  ;;  %v264_v29 = vsel %vm259_vm5, %v261_v25, %v263_v26  ;;  %v1140_v39 = vpack.c.bf16 %v936_v38, %v935_v37  ;;  %v926_v41 = vld [vmem:[%s1449_s3 + $0x38] sm:$0xff]  ;;  %v922_v43 = vld [vmem:[%s1448_s2] ss:$0 sm:$0xff]  ;;  %v937_v48 = vld [vmem:[%s1449_s3 + $0x50] sm:$0xff]  ;;  %vm402_vm6 = vcmask 261120   ;;  %v1243_v9 = vmov 0.0|0.0   ;;  %p1214_p8 = scmp.ne.s32.totalorder %s899_s16, %s1213_s17  ;;  %p1219_p10 = scmp.lt.s32.totalorder %s1213_s17, %s1213_s17 }
  0x1b   :  { %1009 = vmatmul.mubr.msk.f32.vlgmr.msra.gmra.mrb[0].mxu0 %vm62_vm4, %v59_v18  ;;  %1135 = vmatpush3.bf16.msra.mxu1 %v1132_v23  ;;  %v266_v30 = vsel %vm259_vm5, %v263_v26, %v265_v28  ;;  %v1128_v42 = vpack.c.bf16 %v926_v41, %v925_v40  ;;  %v938_v49 = vld [vmem:[%s1449_s3 + $0x58] sm:$0xff]  ;;  %vm1244_vm7 = vmmov 0   ;;  %v1245_v10 = vmov 0.0   ;;  %v801_v11 = vld [vmem:[%s1451_s5] sm:$0xff]  ;;  %v806_v18 = vld [vmem:[%s1451_s5 + $0x28] sm:$0xff] }
  0x1c   :  { %1117 = vmatpush3.bf16.msk.msra.mxu0 %vm1300_vm2, %v1112_v13  ;;  %1011 = vmatprep.mubr.msk.f32.mxu0 %vm62_vm4, %v61_v21  ;;  %v1144_v57 = vpack.c.bf16 %v938_v49, %v937_v48  ;;  %v803_v13 = vld [vmem:[%s1451_s5 + $0x10] sm:$0xff]  ;;  %v804_v15 = vld [vmem:[%s1451_s5 + $0x18] sm:$0xff]  ;;  %v805_v17 = vld [vmem:[%s1451_s5 + $0x20] sm:$0xff]  ;;  %v713_v23 = vlaneseq  ;;  %vm727_vm8 = vcmask 1043456   ;;  %vm723_vm13 = vcmask 228352   ;;  %p1220_p11 = por %p1219_p10, %p1218_p9 }
  0x1d   :  { %1120 = vmatprep.subr.msk.bf16.mxu0 %vm1300_vm2, %v1118_v22  ;;  %1137 = vmatprep.subr.bf16.mxu1 %v1136_v33  ;;  %v1159_v16 = vpack.c.bf16 %v804_v15, %v803_v13  ;;  %v1162_v19 = vpack.c.bf16 %v806_v18, %v805_v17  ;;  %v807_v20 = vld [vmem:[%s1451_s5 + $0x30] sm:$0xff]  ;;  %v808_v21 = vld [vmem:[%s1451_s5 + $0x38] sm:$0xff]  ;;  %vm1153_vm11 = vmpackc.low %vm727_vm8, %vm1242_vm1  ;;  %vm816_vm14 = vcmask 523264   ;;  %vm890_vm15 = vcmask 17408  }
  0x1e   :  { %v716_v24 = vshrl.u32 %v713_v23, 7  ;;  %v714_v38 = vand.u32 127, %v713_v23  ;;  %p1221_p12 = pnand %p1220_p11, %p1214_p8 }
  0x1f   :  { %1012 = vmatmul.mubr.msk.f32.gmra.mrb[2].mxu0 %vm62_vm4, %v60_v14  ;;  %1139 = vmatpush3.bf16.msra.mxu1 %v1136_v33 }
  0x20   :  { %1018 = vmatprep.mubr.msk.f32.mxu0 %vm62_vm4, %v41_v3  ;;  %1141 = vmatprep.subr.bf16.mxu1 %v1140_v39 }
  0x23   :  { %1019 = vmatmul.mubr.msk.f32.vlgmr.msra.gmra.mrb[0].mxu0 %vm62_vm4, %v42_v5 }
  0x24   :  { %1123 = vmatpush3.bf16.msk.msra.mxu0 %vm1300_vm2, %v1118_v22  ;;  %1021 = vmatprep.mubr.msk.f32.mxu0 %vm62_vm4, %v43_v7  ;;  %v1165_v22 = vpack.c.bf16 %v808_v21, %v807_v20 }
  0x25   :  { %1125 = vmatprep.subr.bf16.mxu0 %v1124_v36 }
  0x27   :  { %1022 = vmatmul.mubr.msk.f32.gmra.mrb[2].mxu0 %vm62_vm4, %v44_v12  ;;  %v802_v12 = vld [vmem:[%s1451_s5 + $0x8] sm:$0xff] }
  0x28   :  { %1028 = vmatprep.mubr.msk.f32.mxu0 %vm62_vm4, %v262_v27  ;;  %v1156_v14 = vpack.c.bf16 %v802_v12, %v801_v11 }
  0x2b   :  { %1029 = vmatmul.mubr.msk.f32.vlgmr.msra.gmra.mrb[0].mxu0 %vm62_vm4, %v264_v29  ;;  %v717_v29 = vmul.u32 16, %v716_v24 }
  0x2c   :  { %1031 = vmatprep.mubr.msk.f32.mxu0 %vm62_vm4, %v266_v30  ;;  %1127 = vmatpush3.bf16.msra.mxu0 %v1124_v36 }
  0x2d   :  { %1129 = vmatprep.subr.bf16.mxu0 %v1128_v42  ;;  %vm718_vm9 = vcmp.ge.s32.totalorder %v714_v38, %v717_v29 }
  0x2f   :  { %1032 = vmatmul.mubr.msk.f32.gmra.mrb[2].mxu0 %vm62_vm4, %v265_v28  ;;  %v943_v28 = vld [vmem:[%s1450_s4] ss:$0 sm:$0xff] }
  0x30   :  { %1131 = vmatpush3.bf16.msra.mxu0 %v1128_v42 }
  0x31   :  { %1148 = vmatprep.subr.bf16.mxu0 %v1243_v9 }
  0xfe   :  { %v1030_v44 = vpop.f32.mrb[0].mxu0 }
  0xff   :  { %v375_v45 = vadd.f32 %v1030_v44, %v922_v43  ;;  %v344_v46 = vpop.f32.mrb[1].mxu0 }
 0x100   :  { %v374_v47 = vadd.f32 %v922_v43, %v344_v46 }
 0x101   :  { %v379_v50 = vmax.f32 %v375_v45, 0.0 }
 0x102   :  { %v378_v51 = vmax.f32 %v374_v47, 0.0  ;;  %v1033_v52 = vpop.f32.mrb[2].mxu0 }
 0x103   :  { %v396_v53 = vrot.slane %v379_v50, 1  ;;  %v595_v54 = vrot.slane %v379_v50, 2  ;;  %v377_v55 = vadd.f32 %v1033_v52, %v922_v43  ;;  %v354_v56 = vpop.f32.mrb[3].mxu0 }
 0x104   :  { %v395_v58 = vrot.slane %v378_v51, 1  ;;  %v594_v59 = vrot.slane %v378_v51, 2  ;;  %v376_v60 = vadd.f32 %v922_v43, %v354_v56  ;;  %1056 = vmatprep.mubr.msk.f32.mxu1 %vm402_vm6, %v378_v51 }
 0x105   :  { %v381_v61 = vmax.f32 %v377_v55, 0.0  ;;  %1057 = vmatmul.mubr.msk.f32.vlgmr.msra.gmra.mrb[0].mxu1 %vm402_vm6, %v379_v50 }
 0x106   :  { %v380_v62 = vmax.f32 %v376_v60, 0.0  ;;  %1143 = vmatpush3.bf16.msra.mxu1 %v1140_v39  ;;  %v397_v63 = vsel %vm54_vm3, %v395_v58, %v396_v53  ;;  %v596_v0 = vsel %vm259_vm5, %v594_v59, %v595_v54  ;;  %v719_v39 = vadd.s32 12, %v717_v29 }
 0x107   :  { %v400_v1 = vrot.slane %v381_v61, 1  ;;  %v599_v2 = vrot.slane %v381_v61, 2  ;;  %1042 = vmatprep.mubr.msk.f32.mxu0 %vm402_vm6, %v397_v63  ;;  %1145 = vmatprep.subr.bf16.mxu1 %v1144_v57 }
 0x108   :  { %v398_v3 = vrot.slane %v380_v62, 1  ;;  %v597_v4 = vrot.slane %v380_v62, 2  ;;  %1059 = vmatprep.mubr.msk.f32.mxu1 %vm402_vm6, %v380_v62  ;;  %vm720_vm10 = vcmp.lt.s32.totalorder %v714_v38, %v719_v39 }
 0x109   :  { %1060 = vmatmul.mubr.msk.f32.gmra.mrb[2].mxu1 %vm402_vm6, %v381_v61  ;;  %vm721_vm12 = vmand %vm718_vm9, %vm720_vm10 }
 0x10a   :  { %1147 = vmatpush3.bf16.msra.mxu1 %v1144_v57  ;;  %1070 = vmatprep.mubr.msk.f32.mxu1 %vm402_vm6, %v596_v0  ;;  %v399_v5 = vsel %vm54_vm3, %v396_v53, %v398_v3  ;;  %v401_v6 = vsel %vm54_vm3, %v398_v3, %v400_v1  ;;  %v598_v7 = vsel %vm259_vm5, %v595_v54, %v597_v4  ;;  %v722_v51 = vsel %vm721_vm12, 0.083333336, %v1245_v10  ;;  %v946_v54 = vld [vmem:[%s1452_s6] ss:$0 sm:$0xff] }
 0x10b   :  { %1043 = vmatmul.mubr.msk.f32.vlgmr.msra.gmra.mrb[4].mxu0 %vm402_vm6, %v399_v5  ;;  %v600_v8 = vsel %vm259_vm5, %v597_v4, %v599_v2  ;;  %1155 = vmatprep.subr.bf16.mxu1 %v1243_v9 }
 0x10c   :  { %1045 = vmatprep.mubr.msk.f32.mxu0 %vm402_vm6, %v401_v6 }
 0x10d   :  { %1071 = vmatmul.mubr.msk.f32.vlgmr.msra.gmra.mrb[0].mxu1 %vm402_vm6, %v598_v7 }
 0x10e   :  { %1073 = vmatprep.mubr.msk.f32.mxu1 %vm402_vm6, %v600_v8  ;;  %1157 = vmatpush3.bf16.msra.mxu1 %v1156_v14 }
 0x10f   :  { %1046 = vmatmul.mubr.msk.f32.gmra.mrb[6].mxu0 %vm402_vm6, %v400_v1  ;;  %1158 = vmatprep.subr.bf16.mxu1 %v1243_v9 }
 0x110   :  { %1084 = vmatprep.mubr.msk.f32.mxu0 %vm1244_vm7, %v1245_v10 }
 0x111   :  { %1074 = vmatmul.mubr.msk.f32.gmra.mrb[2].mxu1 %vm402_vm6, %v599_v2 }
 0x112   :  { %1103 = vmatprep.mubr.msk.f32.mxu1 %vm1244_vm7, %v1245_v10  ;;  %1160 = vmatpush3.bf16.msra.mxu1 %v1159_v16 }
 0x113   :  { %1161 = vmatprep.subr.bf16.mxu1 %v1243_v9 }
 0x116   :  { %1163 = vmatpush3.bf16.msra.mxu1 %v1162_v19 }
 0x117   :  { %1164 = vmatprep.subr.bf16.mxu1 %v1243_v9 }
 0x11a   :  { %1166 = vmatpush3.bf16.msra.mxu1 %v1165_v22 }
 0x1de   :  { %v1044_v25 = vpop.f32.mrb[4].mxu0 }
 0x1df   :  { %v477_v26 = vpop.f32.mrb[5].mxu0 }
 0x1e0   :  { %v1072_v27 = vpop.f32.mrb[0].mxu1 }
 0x1e1   :  { %v1167_v30 = vadd.f32 %v1072_v27, %v1044_v25  ;;  %v675_v31 = vpop.f32.mrb[1].mxu1 }
 0x1e2   :  { %v1168_v32 = vadd.f32 %v675_v31, %v477_v26  ;;  %v1047_v33 = vpop.f32.mrb[6].mxu0 }
 0x1e3   :  { %v706_v34 = vadd.f32 %v1167_v30, %v943_v28  ;;  %v487_v35 = vpop.f32.mrb[7].mxu0 }
 0x1e4   :  { %v705_v36 = vadd.f32 %v1168_v32, %v943_v28  ;;  %v1075_v37 = vpop.f32.mrb[2].mxu1 }
 0x1e5   :  { %v710_v40 = vmax.f32 %v706_v34, 0.0  ;;  %v1169_v41 = vadd.f32 %v1075_v37, %v1047_v33  ;;  %v685_v42 = vpop.f32.mrb[3].mxu1 }
 0x1e6   :  { %v709_v43 = vmax.f32 %v705_v36, 0.0  ;;  %v1170_v44 = vadd.f32 %v685_v42, %v487_v35 }
 0x1e7   :  { %v708_v45 = vadd.f32 %v1169_v41, %v943_v28 }
 0x1e8   :  { %v1149_v46 = vpack.c.bf16 %v710_v40, %v709_v43  ;;  %v707_v47 = vadd.f32 %v1170_v44, %v943_v28 }
 0x1e9   :  { %v712_v48 = vmax.f32 %v708_v45, 0.0 }
 0x1ea   :  { %v711_v49 = vmax.f32 %v707_v47, 0.0  ;;  %1150 = vmatpush3.bf16.msra.mxu0 %v1149_v46 }
 0x1eb   :  { %1151 = vmatprep.subr.bf16.mxu0 %v1243_v9 }
 0x1ec   :  { %v1152_v50 = vpack.c.bf16 %v712_v48, %v711_v49 }
 0x1ee   :  { %1154 = vmatpush3.bf16.msk.msra.mxu0 %vm1153_vm11, %v1152_v50 }
 0x1f1   :  { %1085 = vmatmul.mubr.msk.f32.vlgmr.msra.gmra.mrb[8].mxu0 %vm723_vm13, %v722_v51 }
 0x2c4   :  { %v797_v52 = vpop.f32.mrb[8].mxu0 }
 0x2c5   :  { %v1086_v53 = vpop.f32.mrb[9].mxu0  ;;  %1104 = vmatmul.mubr.msk.f32.vlgmr.msra.gmra.mrb[4].mxu1 %vm816_vm14, %v797_v52 }
 0x398   :  { %v886_v55 = vpop.f32.mrb[4].mxu1 }
 0x399   :  { %v887_v56 = vadd.f32 %v946_v54, %v886_v55  ;;  %v1105_v57 = vpop.f32.mrb[5].mxu1 }
 0x39b   :  { %891 = vst.msk [vmem:[#allocation5] sm:$0x3] %vm890_vm15, %v887_v56 }
 0x39c   :  { %1224 = shalt.err (!%p1221_p12)
}
 0x39d   :  { %s1225_s19 = scalar_lea.hbm %s1453_s7, 32 }
 0x39e   :  { %p1226_p13 = scmp.ne.s32.totalorder %s1453_s7, %s1225_s19  ;;  %p1229_p0 = scmp.lt.u32.totalorder %s1225_s19, %s1453_s7 }
 0x3a0   :  { %p1231_p1 = pnand %p1229_p0, %p1226_p13 }
 0x3a2   :  { %1234 = shalt.err (!%p1231_p1)
}
 0x3a3   :  { %901 = dma.vmem_to_hbm [thread:$0]  %s899_s16, 32, %s1453_s7, [#allocation4]  }
 0x3a4   :  { %1237 = dma.done.wait [#allocation4], 32  }
 0x3a5   :  { %1238 = vsyncadd [#allocation4], 4294967264 }
 0x3a6   :  { %905 = vsyncpa [#allocation3], 1 }
 0x3a7   :  { %906 = vsyncpa [#allocation4], 1 }

</bundles_post_ra>
